<compile_context>
chip_gen: v6e
topology: v6e:2x2x1
jax: 0.10.0
libtpu: 0.0.40
codegen_flags: <defaults>
</compile_context>

<pallas_src>
import functools

import jax
import jax.numpy as jnp
from jax.experimental import pallas as pl
from jax.experimental.pallas import tpu as pltpu


# ----------------------------------------------------------------------------
# Generation-aware VMEM / block budgeting
# ----------------------------------------------------------------------------
_HBM_BLOCK_CAP_BYTES = 4 * 1024 * 1024     # ~4 MiB of HBM-resident data / block
_VMEM_LIMIT_CAP_BYTES = 96 * 1024 * 1024   # never request more than 96 MiB
_SPLIT_THRESHOLD_BYTES = 1 * 1024 * 1024   # split 1-block grids above this
_SMALL_BLOCK_BYTES = 1 * 1024 * 1024       # deepen pipelining below this


@functools.lru_cache(maxsize=None)
def _vmem_limit_bytes():
    """Scoped-VMEM request: ~5/8 of physical VMEM, capped at 96 MiB.

    v5e/v6e (128 MiB physical) -> 80 MiB; v7x (64 MiB per-TC) -> 40 MiB.
    Falls back to the most conservative (v7x) assumption if the query fails.
    """
    phys = 64 * 1024 * 1024
    try:
        info = pltpu.get_tpu_info()
        for name in ("vmem_capacity_bytes", "vmem_bytes", "vmem_size_bytes"):
            v = getattr(info, name, None)
            if v:
                phys = int(v)
                break
    except Exception:
        pass
    return int(min((phys * 5) // 8, _VMEM_LIMIT_CAP_BYTES))


def _sublane_align(itemsize):
    # f32 -> 8, bf16 -> 16, int8/fp8 -> 32 (packed dtypes tile sublanes in
    # pairs/quads; an 8-aligned bf16 tile would leave half-empty vregs).
    return max(8, 32 // max(itemsize, 1))


def _max_block_elems(itemsize, vmem_limit):
    # Per block element: double-buffered input + output (itemsize each) plus
    # ~4 live f32 compute temporaries; budget against half the scoped limit.
    per_elem = 4 * itemsize + 16
    by_vmem = (vmem_limit // 2) // per_elem
    by_hbm = _HBM_BLOCK_CAP_BYTES // itemsize
    return max(1, min(by_vmem, by_hbm))


def _round_up(x, m):
    return ((x + m - 1) // m) * m


def _pick_tile_rows(num_rows, row_elems, itemsize, vmem_limit):
    """Row tile for a (num_rows, row_elems) view; rows are independent."""
    align = _sublane_align(itemsize)
    budget_rows = max(align,
                      _max_block_elems(itemsize, vmem_limit) // max(row_elems, 1))
    if budget_rows >= num_rows:
        # One block would cover everything: split in two so both TensorCores
        # (v7x megacore) get streaming work when the problem is big enough.
        if (num_rows >= 2 * align
                and num_rows * row_elems * itemsize >= _SPLIT_THRESHOLD_BYTES):
            return min(_round_up(pl.cdiv(num_rows, 2), align), num_rows)
        return num_rows                       # full extent: always a legal block dim
    return max(align, (budget_rows // align) * align)


def _pick_tile_hw(hw, c, n, itemsize, vmem_limit):
    """H*W (lane) tile for the NCHW path; columns are independent groups."""
    budget_cols = max(128, _max_block_elems(itemsize, vmem_limit) // max(c, 1))
    if budget_cols >= hw:
        if (n == 1 and hw >= 256
                and c * hw * itemsize >= _SPLIT_THRESHOLD_BYTES):
            return min(_round_up(pl.cdiv(hw, 2), 128), hw)   # 2 blocks for megacore
        return hw
    return max(128, (budget_cols // 128) * 128)              # lane-aligned stores


def _data_spec(block_shape, index_map, block_bytes, grid_steps):
    """BlockSpec for streamed data; request 3-deep pipelining for small blocks."""
    if block_bytes < _SMALL_BLOCK_BYTES and grid_steps >= 4:
        try:
            return pl.BlockSpec(block_shape, index_map,
                                pipeline_mode=pl.Buffered(3))
        except Exception:  # pipeline_mode/Buffered unavailable -> default depth
            pass
    return pl.BlockSpec(block_shape, index_map)


# ----------------------------------------------------------------------------
# Kernels (all statistics two-pass in f32: mean, then centered sum of squares)
# ----------------------------------------------------------------------------
def _ln_rows_kernel(x_ref, w_ref, b_ref, o_ref, *, eps, inv_c):
    """LayerNorm over the last (lane) axis of a (tile_rows, C) block."""
    x = x_ref[...].astype(jnp.float32)
    mean = jnp.sum(x, axis=-1, keepdims=True) * inv_c
    xc = x - mean
    var = jnp.sum(xc * xc, axis=-1, keepdims=True) * inv_c      # biased var
    inv = jax.lax.rsqrt(var + eps)
    o_ref[...] = (xc * inv * w_ref[...] + b_ref[...]).astype(o_ref.dtype)


def _ln_rows_packed_kernel(x_ref, w_ref, b_ref, o_ref, *, eps, inv_c, c):
    """LayerNorm for C < 128 with 128//C groups packed per 128-lane row.

    Per-group sums come from a (128,128) block-diagonal ones matmul on the
    otherwise-idle MXU (precision=HIGHEST keeps the f32 stats exact), so all
    loads/stores stay lane-dense instead of 128//C-way masked.
    """
    x = x_ref[...].astype(jnp.float32)                            # (tile, 128)
    gi = jax.lax.broadcasted_iota(jnp.int32, (128, 128), 0) // c
    gj = jax.lax.broadcasted_iota(jnp.int32, (128, 128), 1) // c
    seg = (gi == gj).astype(jnp.float32)                          # block-diag ones
    mean = jnp.dot(x, seg, preferred_element_type=jnp.float32,
                   precision=jax.lax.Precision.HIGHEST) * inv_c
    xc = x - mean
    var = jnp.dot(xc * xc, seg, preferred_element_type=jnp.float32,
                  precision=jax.lax.Precision.HIGHEST) * inv_c
    inv = jax.lax.rsqrt(var + eps)
    o_ref[...] = (xc * inv * w_ref[...] + b_ref[...]).astype(o_ref.dtype)


def _ln_nchw_kernel(x_ref, w_ref, b_ref, o_ref, *, eps, inv_c):
    """LayerNorm over the channel (sublane) axis of a (1, C, tile_hw) block."""
    x = x_ref[...].astype(jnp.float32)
    mean = jnp.sum(x, axis=1, keepdims=True) * inv_c
    xc = x - mean
    var = jnp.sum(xc * xc, axis=1, keepdims=True) * inv_c
    inv = jax.lax.rsqrt(var + eps)
    o_ref[...] = (xc * inv * w_ref[...] + b_ref[...]).astype(o_ref.dtype)


# ----------------------------------------------------------------------------
# Wrappers
# ----------------------------------------------------------------------------
def _layer_norm_channels_last(x, weight_f32, bias_f32, eps):
    C = x.shape[-1]
    total = int(x.size)
    R = total // C
    itemsize = x.dtype.itemsize
    vmem_limit = _vmem_limit_bytes()

    packed = (C < 128) and (128 % C == 0) and (total % 128 == 0) and (total >= 128)
    if packed:
        k = 128 // C
        rows, cols = total // 128, 128
        x2 = x.reshape(rows, cols)                     # free row-major reshape
        w2 = jnp.tile(weight_f32, k).reshape(1, cols)  # lane j -> weight[j % C]
        b2 = jnp.tile(bias_f32, k).reshape(1, cols)
        kernel = functools.partial(_ln_rows_packed_kernel,
                                   eps=eps, inv_c=1.0 / C, c=C)
        mm_flops = 2 * 2 * rows * cols * cols          # two (rows,128)@(128,128)
    else:
        # TODO(synk): C < 128 with 128 % C != 0 keeps masked lane stores here.
        rows, cols = R, C
        x2 = x.reshape(rows, cols)
        w2 = weight_f32.reshape(1, cols)
        b2 = bias_f32.reshape(1, cols)
        kernel = functools.partial(_ln_rows_kernel, eps=eps, inv_c=1.0 / C)
        mm_flops = 0

    tile = _pick_tile_rows(rows, cols, itemsize, vmem_limit)
    grid = (pl.cdiv(rows, tile),)
    block_bytes = tile * cols * itemsize
    xo_spec = _data_spec((tile, cols), lambda i: (i, 0), block_bytes, grid[0])

    out = pl.pallas_call(
        kernel,
        out_shape=jax.ShapeDtypeStruct((rows, cols), x.dtype),
        grid_spec=pltpu.PrefetchScalarGridSpec(
            num_scalar_prefetch=0,
            grid=grid,
            in_specs=[
                xo_spec,                                        # x row tile
                pl.BlockSpec((1, cols), lambda i: (0, 0)),      # weight (resident)
                pl.BlockSpec((1, cols), lambda i: (0, 0)),      # bias   (resident)
            ],
            out_specs=xo_spec,
        ),
        compiler_params=pltpu.CompilerParams(
            dimension_semantics=("parallel",),
            vmem_limit_bytes=vmem_limit,
        ),
        cost_estimate=pl.CostEstimate(
            flops=int(10 * total + mm_flops),
            transcendentals=int(R),
            bytes_accessed=int(2 * total * itemsize),
        ),
    )(x2, w2, b2)
    return out.reshape(x.shape)


def _layer_norm_channels_first(x, weight_f32, bias_f32, eps):
    """LayerNorm over axis 1 of an (N, C, *spatial) array — handled natively
    in NCHW (reduction over sublanes, H*W on the lane axis, no transposes)."""
    N, C = x.shape[0], x.shape[1]
    HW = 1
    for d in x.shape[2:]:
        HW *= int(d)
    itemsize = x.dtype.itemsize
    vmem_limit = _vmem_limit_bytes()

    x3 = x.reshape(N, C, HW)                           # free (metadata) reshape
    w3 = weight_f32.reshape(1, C, 1)
    b3 = bias_f32.reshape(1, C, 1)

    tile_hw = _pick_tile_hw(HW, C, N, itemsize, vmem_limit)
    grid = (N, pl.cdiv(HW, tile_hw))
    block_bytes = C * tile_hw * itemsize
    xo_spec = _data_spec((1, C, tile_hw), lambda n, j: (n, 0, j),
                         block_bytes, grid[0] * grid[1])

    out = pl.pallas_call(
        functools.partial(_ln_nchw_kernel, eps=eps, inv_c=1.0 / C),
        out_shape=jax.ShapeDtypeStruct((N, C, HW), x.dtype),
        grid_spec=pltpu.PrefetchScalarGridSpec(
            num_scalar_prefetch=0,
            grid=grid,
            in_specs=[
                xo_spec,                                            # x tile
                pl.BlockSpec((1, C, 1), lambda n, j: (0, 0, 0)),    # weight
                pl.BlockSpec((1, C, 1), lambda n, j: (0, 0, 0)),    # bias
            ],
            out_specs=xo_spec,
        ),
        compiler_params=pltpu.CompilerParams(
            dimension_semantics=("parallel", "parallel"),
            vmem_limit_bytes=vmem_limit,
        ),
        cost_estimate=pl.CostEstimate(
            flops=int(10 * N * C * HW),
            transcendentals=int(N * HW),
            bytes_accessed=int(2 * N * C * HW * itemsize),
        ),
    )(x3, w3, b3)
    return out.reshape(x.shape)


# ----------------------------------------------------------------------------
# Module
# ----------------------------------------------------------------------------
class LayerNorm:
    """JAX/Pallas port of the PyTorch LayerNorm module (both data formats)."""

    def __init__(self, normalized_shape, eps=1e-6, data_format="channels_last"):
        if data_format not in ("channels_last", "channels_first"):
            raise NotImplementedError
        c = int(normalized_shape)
        # Matches nn.Parameter(torch.ones/zeros); params kept in float32.
        # eps default 1e-6 matches the module spec (not torch.nn.LayerNorm's 1e-5).
        self.weight = jnp.ones((c,), jnp.float32)
        self.bias = jnp.zeros((c,), jnp.float32)
        self.eps = float(eps)
        self.data_format = data_format
        self.normalized_shape = (c,)

    def __call__(self, x):
        w = self.weight.astype(jnp.float32)
        b = self.bias.astype(jnp.float32)
        if self.data_format == "channels_last":
            return _layer_norm_channels_last(x, w, b, self.eps)
        else:  # channels_first (NCHW) — handled natively, no transposes.
            return _layer_norm_channels_first(x, w, b, self.eps)


# ----------------------------------------------------------------------------
# Reference + self-test
# ----------------------------------------------------------------------------
def _ref_layernorm(x, weight, bias, eps, axis):
    xf = x.astype(jnp.float32)
    u = jnp.mean(xf, axis=axis, keepdims=True)
    s = jnp.mean((xf - u) ** 2, axis=axis, keepdims=True)
    xn = (xf - u) / jnp.sqrt(s + eps)
    shape = [1] * x.ndim
    shape[axis] = x.shape[axis]
    return (xn * weight.reshape(shape) + bias.reshape(shape)).astype(x.dtype)


if __name__ == "__main__":
    key = jax.random.PRNGKey(0)
    k1, k2, k3 = jax.random.split(key, 3)

    # channels_first: NCHW input (2, 4, 16, 16), normalize over C=4.
    x_cf = jax.random.normal(k1, (2, 4, 16, 16), dtype=jnp.float32)
    ln_cf = LayerNorm(4, eps=1e-6, data_format="channels_first")
    ln_cf.weight = 1.0 + 0.01 * jnp.arange(4, dtype=jnp.float32)
    ln_cf.bias = 0.1 * jnp.arange(4, dtype=jnp.float32)
    y_cf = jax.block_until_ready(ln_cf(x_cf))
    ref_cf = _ref_layernorm(x_cf, ln_cf.weight, ln_cf.bias, ln_cf.eps, axis=1)

    # channels_last, C=32 (< 128): exercises the lane-dense packed MXU path.
    x_cl = jax.random.normal(k2, (2, 8, 8, 32), dtype=jnp.float32)
    ln_cl = LayerNorm(32, eps=1e-6, data_format="channels_last")
    ln_cl.weight = 1.0 + 0.01 * jnp.arange(32, dtype=jnp.float32)
    ln_cl.bias = 0.1 * jnp.arange(32, dtype=jnp.float32)
    y_cl = jax.block_until_ready(ln_cl(x_cl))
    ref_cl = _ref_layernorm(x_cl, ln_cl.weight, ln_cl.bias, ln_cl.eps, axis=-1)

    # channels_last, C=192 (>= 128): exercises the plain lane-reduction path.
    x_cw = jax.random.normal(k3, (4, 8, 192), dtype=jnp.float32)
    ln_cw = LayerNorm(192, eps=1e-6, data_format="channels_last")
    ln_cw.weight = 1.0 + 0.01 * jnp.arange(192, dtype=jnp.float32)
    ln_cw.bias = 0.1 * jnp.arange(192, dtype=jnp.float32)
    y_cw = jax.block_until_ready(ln_cw(x_cw))
    ref_cw = _ref_layernorm(x_cw, ln_cw.weight, ln_cw.bias, ln_cw.eps, axis=-1)

    assert y_cf.shape == x_cf.shape
    assert y_cl.shape == x_cl.shape
    assert y_cw.shape == x_cw.shape
    assert jnp.allclose(y_cf, ref_cf, atol=1e-4, rtol=1e-4)
    assert jnp.allclose(y_cl, ref_cl, atol=1e-4, rtol=1e-4)
    assert jnp.allclose(y_cw, ref_cw, atol=1e-4, rtol=1e-4)
    print("KERNEL_OK")
</pallas_src>

<mosaic_0001>
module attributes {stable_mosaic.version = 11 : i64} {
  func.func @_ln_nchw_kernel(%arg0: i32, %arg1: i32, %arg2: memref<1x4x256xf32, #tpu.memory_space<vmem>>, %arg3: memref<1x4x1xf32, #tpu.memory_space<vmem>>, %arg4: memref<1x4x1xf32, #tpu.memory_space<vmem>>, %arg5: memref<1x4x256xf32, #tpu.memory_space<vmem>>) attributes {dimension_semantics = [#tpu.dimension_semantics<parallel>, #tpu.dimension_semantics<parallel>], iteration_bounds = array<i64: 2, 1>, scalar_prefetch = 0 : i64, scratch_operands = 0 : i64, tpu.core_type = #tpu.core_type<tc>, window_params = [{transform_indices = @transform_0, window_bounds = array<i64: 1, 4, 256>}, {pipeline_mode = #tpu.pipeline_mode<synchronous>, transform_indices = @transform_1, window_bounds = array<i64: 1, 4, 1>}, {pipeline_mode = #tpu.pipeline_mode<synchronous>, transform_indices = @transform_2, window_bounds = array<i64: 1, 4, 1>}, {transform_indices = @transform_3, window_bounds = array<i64: 1, 4, 256>}]} {
    %c0 = arith.constant 0 : index
    %c0_0 = arith.constant 0 : index
    %c0_1 = arith.constant 0 : index
    %0 = vector.load %arg2[%c0, %c0_0, %c0_1] : memref<1x4x256xf32, #tpu.memory_space<vmem>>, vector<1x4x256xf32>
    %cst = arith.constant dense<0.000000e+00> : vector<1x256xf32>
    %1 = vector.multi_reduction <add>, %0, %cst [1] : vector<1x4x256xf32> to vector<1x256xf32>
    %2 = vector.shape_cast %1 : vector<1x256xf32> to vector<1x1x256xf32>
    %cst_2 = arith.constant 2.500000e-01 : f32
    %3 = vector.broadcast %cst_2 : f32 to vector<1x1x256xf32>
    %4 = arith.mulf %2, %3 : vector<1x1x256xf32>
    %5 = vector.broadcast %4 : vector<1x1x256xf32> to vector<1x4x256xf32>
    %6 = arith.subf %0, %5 : vector<1x4x256xf32>
    %7 = arith.mulf %6, %6 : vector<1x4x256xf32>
    %cst_3 = arith.constant dense<0.000000e+00> : vector<1x256xf32>
    %8 = vector.multi_reduction <add>, %7, %cst_3 [1] : vector<1x4x256xf32> to vector<1x256xf32>
    %9 = vector.shape_cast %8 : vector<1x256xf32> to vector<1x1x256xf32>
    %cst_4 = arith.constant 2.500000e-01 : f32
    %10 = vector.broadcast %cst_4 : f32 to vector<1x1x256xf32>
    %11 = arith.mulf %9, %10 : vector<1x1x256xf32>
    %cst_5 = arith.constant 9.99999997E-7 : f32
    %12 = vector.broadcast %cst_5 : f32 to vector<1x1x256xf32>
    %13 = arith.addf %11, %12 : vector<1x1x256xf32>
    %14 = math.rsqrt %13 : vector<1x1x256xf32>
    %15 = vector.broadcast %14 : vector<1x1x256xf32> to vector<1x4x256xf32>
    %16 = arith.mulf %6, %15 : vector<1x4x256xf32>
    %c0_6 = arith.constant 0 : index
    %c0_7 = arith.constant 0 : index
    %c0_8 = arith.constant 0 : index
    %17 = vector.load %arg3[%c0_6, %c0_7, %c0_8] : memref<1x4x1xf32, #tpu.memory_space<vmem>>, vector<1x4x1xf32>
    %18 = vector.broadcast %17 : vector<1x4x1xf32> to vector<1x4x256xf32>
    %19 = arith.mulf %16, %18 : vector<1x4x256xf32>
    %c0_9 = arith.constant 0 : index
    %c0_10 = arith.constant 0 : index
    %c0_11 = arith.constant 0 : index
    %20 = vector.load %arg4[%c0_9, %c0_10, %c0_11] : memref<1x4x1xf32, #tpu.memory_space<vmem>>, vector<1x4x1xf32>
    %21 = vector.broadcast %20 : vector<1x4x1xf32> to vector<1x4x256xf32>
    %22 = arith.addf %19, %21 : vector<1x4x256xf32>
    %c0_12 = arith.constant 0 : index
    %c0_13 = arith.constant 0 : index
    %c0_14 = arith.constant 0 : index
    %23 = vector.load %arg5[%c0_12, %c0_13, %c0_14] : memref<1x4x256xf32, #tpu.memory_space<vmem>>, vector<1x4x256xf32>
    tpu.vector_store %arg5[%c0_12, %c0_13, %c0_14], %22 {strides = array<i32>} : memref<1x4x256xf32, #tpu.memory_space<vmem>>, vector<1x4x256xf32>,
    return
  }
  func.func @transform_0(%arg0: i32, %arg1: i32) -> (i32, i32, i32) {
    %c0_i32 = arith.constant 0 : i32
    %c0_i32_0 = arith.constant 0 : i32
    return %arg0, %c0_i32, %arg1 : i32, i32, i32
  }
  func.func @transform_1(%arg0: i32, %arg1: i32) -> (i32, i32, i32) {
    %c0_i32 = arith.constant 0 : i32
    %c0_i32_0 = arith.constant 0 : i32
    %c0_i32_1 = arith.constant 0 : i32
    %c0_i32_2 = arith.constant 0 : i32
    return %c0_i32, %c0_i32_0, %c0_i32_1 : i32, i32, i32
  }
  func.func @transform_2(%arg0: i32, %arg1: i32) -> (i32, i32, i32) {
    %c0_i32 = arith.constant 0 : i32
    %c0_i32_0 = arith.constant 0 : i32
    %c0_i32_1 = arith.constant 0 : i32
    %c0_i32_2 = arith.constant 0 : i32
    return %c0_i32, %c0_i32_0, %c0_i32_1 : i32, i32, i32
  }
  func.func @transform_3(%arg0: i32, %arg1: i32) -> (i32, i32, i32) {
    %c0_i32 = arith.constant 0 : i32
    %c0_i32_0 = arith.constant 0 : i32
    return %arg0, %c0_i32, %arg1 : i32, i32, i32
  }
}

</mosaic_0001>

<bundles_post_ra>
// kernel: tpu_custom_call.1
= control target key start
LH: loop header
LB: loop body
LE: loop exit
PB: predicated region body
PF: predicated region fallthrough
CT: control target
= control target key end

     0   :  { %8 = vsyncpa [#allocation3], 0  ;;  %s761_s0 = inlined_call_operand.hbm [shape: f32[2,4,256], index: 0, kind: input, shape index: {}]   ;;  %s762_s1 = inlined_call_operand.vmem [shape: f32[1,4,1], index: 1, kind: input, shape index: {}]   ;;  %s763_s2 = inlined_call_operand.vmem [shape: f32[1,4,1], index: 2, kind: input, shape index: {}]   ;;  %s764_s3 = inlined_call_operand.hbm [shape: f32[2,4,256], index: 3, kind: output, shape index: {}]  }
   0x1   :  { %10 = vsyncpa [#allocation3 + $0x1], 0 }
   0x2   :  { %11 = vsyncpa [#allocation4], 0 }
   0x3   :  { %13 = vsyncpa [#allocation4 + $0x1], 0  ;;  %s613_s12 = smov 0   ;;  %s615_s13 = smov 0  }
   0x4   :  { %s617_s14 = smov 0   ;;  %s619_s15 = smov 0  }
   0x5   :  { %s621_s16 = smov 0   ;;  %s623_s17 = smov 0  }
   0x6 LB: > { %s392_s18 = sadd.s32 4294967295, %s587_s17   ;;  %s393_s19 = sadd.s32 4294967294, %s587_s17   ;;  %s587_s17 = sphi %s623_s17, %s19_s17   ;;  %s583_s16 = sphi %s621_s16, %s776_s16   ;;  %s579_s15 = sphi %s619_s15, %s775_s15   ;;  %s575_s14 = sphi %s617_s14, %s774_s14   ;;  %s571_s13 = sphi %s615_s13, %s773_s13   ;;  %s567_s12 = sphi %s613_s12, %s772_s12  }
   0x7   : > { %s31_s20 = sadd.s32 1, %s583_s16  ;;  %s40_s21 = sadd.s32 1, %s575_s14 }
   0x8   : > { %p33_p0 = scmp.ge.s32.totalorder %s31_s20, 2  ;;  %p47_p1 = scmp.ne.s32.totalorder %s575_s14, %s571_s13 }
   0x9   : > { %p48_p2 = scmp.eq.s32.totalorder %s587_s17, 0  ;;  %p53_p3 = scmp.ne.s32.totalorder %s571_s13, %s567_s12 }
   0xa   : > { %s778_s20 = smov (%p33_p0, %s31_s20), 0  ;;  %p54_p5 = scmp.eq.s32.totalorder %s392_s18, 0 }
   0xb   : > { %p654_p4 = por %p48_p2, %p47_p1  ;;  %s35_s23 = ssub.s32 %s583_s16, %s778_s20 }
   0xc   : > { %p121_p6 = scmp.eq.s32.totalorder %s392_s18, 1  ;;  %p38_p7 = scmp.eq.s32.totalorder %s35_s23, 0 }
   0xd   : > { %p660_p8 = por %p54_p5, %p53_p3  ;;  %p127_p10 = scmp.eq.s32.totalorder %s393_s19, 1 }
   0xe   : > { %p664_p9 = por %p121_p6, %p47_p1  ;;  %p421_p13 = scmp.lt.s32.totalorder %s587_s17, 2 }
   0xf   : > { %s669_s26 = scalar_select %p38_p7, %s575_s14, %s40_s21  }
  0x10   : > { %p671_p11 = por %p127_p10, %p53_p3  ;;  %s153_s28 = sand.u32 1, %s575_s14  }
  0x11   : > { %s396_s29 = sshll.u32 %s153_s28, 3  ;;  %s407_s30 = sshll.u32 %s583_s16, 7 }
  0x12   : > { %s768_s27 = scalar_select %p671_p11, 1, 0 }
  0x13   : > { %s165_s6 = scalar_lea.hbm %s761_s0, %s407_s30  ;;  %s157_s7 = scalar_lea.vmem [#allocation2], %s396_s29 }
  0x14   : > { %s167_s8 = sshll.u32 %s157_s7, 4  ;;  %p684_p0 = pnand %p421_p13, %p654_p4  ;;  %s168_s8 = int_to_ptr.vmem [resolvable:$true] %s167_s8 }
  0x15   : > { %p399_p1 = scmp.ge.s32.totalorder %s587_s17, 1  ;;  %p172_p2 = scmp.lt.s32.totalorder %s587_s17, 3 }
  0x16   : > { %s154_s10 = scalar_lea.sflag [#allocation3], %s153_s28  ;;  %p481_p3 = pneg %p684_p0 }
  0x17   : > { %s492_s11 = scalar_lea.vmem %s168_s8, 128  ;;  %s589_s18 = smov [#allocation2]  }
  0x18   : > { %p493_p5 = scmp.ne.s32.totalorder %s168_s8, %s492_s11  ;;  %s497_s19 = sshll.u32 %s589_s18, 4  ;;  %s498_s19 = int_to_ptr.vmem [resolvable:$false] %s497_s19 }
  0x19   : > { %s499_s21 = scalar_lea.vmem %s498_s19, 256  ;;  %p500_p10 = scmp.lt.s32.totalorder %s168_s8, %s498_s19 }
  0x1a   : > { %p495_p6 = pnand %p493_p5, %p481_p3  ;;  %p501_p12 = scmp.lt.s32.totalorder %s499_s21, %s492_s11 }
  0x1c   : > { %p496_p7 = pneg %p495_p6  ;;  %p502_p4 = por %p501_p12, %p500_p10 }
  0x1e   : > { %p503_p13 = pnand %p502_p4, %p496_p7 }
  0x20   : > { %506 = shalt.err (!%p503_p13)
}
  0x21   : > { %416 = dma.hbm_to_vmem [thread:$0]  (!%p684_p0), %s165_s6, 128, %s168_s8, %s154_s10  }
  0x22   : > { %p173_p11 = pnand %p399_p1, %p172_p2 }
  0x23   : > { %s699_s22 = sand.u32 (!%p173_p11), 1, %s571_s13  }
  0x24   : > { %176 = sbr.rel (%p173_p11) target bundleno = 189 (0xbd), region = 32  ;;  %s400_s23 = sshll.u32 (!%p173_p11), %s699_s22, 3 }
  0x25   : > { %s179_s28 = scalar_lea.sflag (!%p173_p11), [#allocation3], %s699_s22  ;;  %s182_s29 = scalar_lea.vmem (!%p173_p11), [#allocation2], %s400_s23 }
  0x29   : > { %558 = dma.done.wait (%p660_p8), %s179_s28, 128  }
  0x2a   : > { %560 = vsyncadd (%p660_p8), %s179_s28, 4294967168  ;;  %v590_v0 = vmov 0   ;;  %v262_v1 = vld [vmem:[%s762_s1] sm:$0xf]  ;;  %vm211_vm0 = vcmask 1043456   ;;  %v270_v45 = vlaneseq  ;;  %s408_s24 = sshll.u32 %s579_s15, 7 }
  0x2b   : > { %473 = vset.pattern.permute.xlu0 %v590_v0  ;;  %v276_v2 = vld [vmem:[%s763_s2] sm:$0xf]  ;;  %v591_v43 = vmov 839922192   ;;  %s204_s7 = scalar_lea.vmem [#allocation5], %s400_s23  ;;  %s306_s11 = scalar_lea.hbm %s764_s3, %s408_s24 }
  0x2c   : > { %265 = vperm.xlu0 %473, %v262_v1   ;;  %v207_v3 = vld [vmem:[%s182_s29] sm:$0xff]  ;;  %v268_v44 = vunpack.c.l.s4 %v591_v43  ;;  %v271_v48 = vshrl.u32 %v270_v45, 7  ;;  %s308_s8 = sshll.u32 %s204_s7, 4  ;;  %s292_s18 = scalar_lea.sflag [#allocation4], %s699_s22  ;;  %s309_s8 = int_to_ptr.vmem [resolvable:$true] %s308_s8 }
  0x2d   : > { %v209_v4 = vcombine.high %v207_v3, %v207_v3  ;;  %v212_v5 = vsel %vm211_vm0, %v207_v3, 0.0  ;;  %s507_s19 = scalar_lea.vmem %s309_s8, 128  ;;  %s592_s21 = smov [#allocation5]  }
  0x2e   : > { %v213_v7 = vrot.slane %v212_v5, 4  ;;  %v269_v47 = vunpack.c.0.s8 %v268_v44  ;;  %p508_p8 = scmp.ne.s32.totalorder %s309_s8, %s507_s19  ;;  %s511_s15 = sshll.u32 %s592_s21, 4  ;;  %s512_s15 = int_to_ptr.vmem [resolvable:$false] %s511_s15 }
  0x2f   : > { %v219_v6 = vsel %vm211_vm0, %v209_v4, 0.0  ;;  %s513_s23 = scalar_lea.vmem %s512_s15, 256  ;;  %p514_p0 = scmp.lt.s32.totalorder %s309_s8, %s512_s15 }
  0x30   : > { %279 = vperm.xlu0 %473, %v276_v2   ;;  %v220_v8 = vrot.slane %v219_v6, 4  ;;  %v214_v9 = vadd.f32 %v213_v7, %v212_v5  ;;  %v272_v50 = vsub.s32 %v269_v47, %v271_v48  ;;  %p509_p11 = pnand %p508_p8, %p664_p9  ;;  %p515_p1 = scmp.lt.s32.totalorder %s513_s23, %s507_s19 }
  0x32   : > { %v221_v10 = vadd.f32 %v220_v8, %v219_v6  ;;  %v215_v11 = vrot.slane %v214_v9, 2  ;;  %p510_p12 = pneg %p509_p11  ;;  %p516_p2 = por %p515_p1, %p514_p0 }
  0x34   : > { %v222_v12 = vrot.slane %v221_v10, 2  ;;  %v216_v13 = vadd.f32 %v215_v11, %v214_v9  ;;  %p517_p3 = pnand %p516_p2, %p510_p12 }
  0x36   : > { %v223_v14 = vadd.f32 %v222_v12, %v221_v10  ;;  %v217_v15 = vrot.slane %v216_v13, 1 }
  0x38   : > { %v224_v16 = vrot.slane %v223_v14, 1  ;;  %v218_v17 = vadd.f32 %v217_v15, %v216_v13 }
  0x3a   : > { %v225_v18 = vadd.f32 %v224_v16, %v223_v14  ;;  %v226_v19 = vmul.f32 0.25, %v218_v17 }
  0x3c   : > { %v227_v20 = vmul.f32 0.25, %v225_v18 }
  0x3e   : > { %v230_v21 = vcombine.low %v226_v19, %v227_v20 }
  0x40   : > { %v232_v22 = vsub.f32 %v207_v3, %v230_v21 }
  0x42   : > { %v233_v23 = vmul.f32 %v232_v22, %v232_v22 }
  0x44   : > { %v235_v24 = vcombine.high %v233_v23, %v233_v23  ;;  %v237_v25 = vsel %vm211_vm0, %v233_v23, 0.0 }
  0x45   : > { %v238_v27 = vrot.slane %v237_v25, 4 }
  0x46   : > { %v244_v26 = vsel %vm211_vm0, %v235_v24, 0.0 }
  0x47   : > { %v245_v28 = vrot.slane %v244_v26, 4  ;;  %v239_v29 = vadd.f32 %v238_v27, %v237_v25 }
  0x49   : > { %v246_v30 = vadd.f32 %v245_v28, %v244_v26  ;;  %v240_v31 = vrot.slane %v239_v29, 2 }
  0x4b   : > { %v247_v32 = vrot.slane %v246_v30, 2  ;;  %v241_v33 = vadd.f32 %v240_v31, %v239_v29 }
  0x4d   : > { %v248_v34 = vadd.f32 %v247_v32, %v246_v30  ;;  %v242_v35 = vrot.slane %v241_v33, 1 }
  0x4f   : > { %v249_v36 = vrot.slane %v248_v34, 1  ;;  %v243_v37 = vadd.f32 %v242_v35, %v241_v33 }
  0x51   : > { %v250_v38 = vadd.f32 %v249_v36, %v248_v34  ;;  %v251_v39 = vmul.f32 0.25, %v243_v37 }
  0x53   : > { %v252_v40 = vmul.f32 0.25, %v250_v38  ;;  %v253_v41 = vadd.f32 1e-06, %v251_v39 }
  0x55   : > { %v254_v42 = vadd.f32 1e-06, %v252_v40  ;;  %475 = vrsqrt.f32 %v253_v41 }
  0x57   : > { %477 = vrsqrt.f32 %v254_v42 }
  0x62   : > { %v476_v46 = vpop.eup %475 }
  0x64   : > { %v478_v49 = vpop.eup %477 }
  0x65   : > { %v259_v51 = vcombine.low %v476_v46, %v478_v49 }
  0x67   : > { %v261_v53 = vmul.f32 %v259_v51, %v232_v22 }
  0xa7   : > { %v266_v52 = vpop.permute.xlu0 %265 }
  0xa8   : > { %v273_v54 = vrot.slane %v266_v52, %v272_v50 }
  0xaa   : > { %v275_v56 = vmul.f32 %v273_v54, %v261_v53 }
  0xab   : > { %v280_v55 = vpop.permute.xlu0 %279 }
  0xac   : > { %v287_v57 = vrot.slane %v280_v55, %v272_v50 }
  0xae   : > { %v289_v58 = vadd.f32 %v287_v57, %v275_v56 }
  0xb0   : > { %290 = vst [vmem:[%s204_s7] sm:$0xff] %v289_v58 }
  0xb1   : > { %520 = shalt.err (!%p517_p3)
}
  0xb2   : > { %s521_s28 = scalar_lea.hbm %s306_s11, 128  ;;  %s525_s30 = scalar_lea.hbm %s764_s3, 256 }
  0xb3   : > { %p522_p5 = scmp.ne.s32.totalorder %s306_s11, %s521_s28  ;;  %p526_p10 = scmp.lt.s32.totalorder %s306_s11, %s764_s3 }
  0xb4   : > { %p527_p4 = scmp.lt.s32.totalorder %s525_s30, %s521_s28 }
  0xb5   : > { %p523_p6 = pnand %p522_p5, %p664_p9 }
  0xb6   : > { %p528_p13 = por %p527_p4, %p526_p10 }
  0xb7   : > { %p524_p7 = pneg %p523_p6 }
  0xb9   : > { %p529_p8 = pnand %p528_p13, %p524_p7 }
  0xbb   : > { %532 = shalt.err (!%p529_p8)
}
  0xbc   : > { %411 = dma.vmem_to_hbm [thread:$0]  (%p664_p9), %s309_s8, 128, %s306_s11, %s292_s18  }
  0xbd PF: > { %s320_s6 = sand.u32 1, %s567_s12   ;;  %p770_p11 = scmp.ne.s32.totalorder %s768_s27, 0 }
  0xbe   : > { %p771_p12 = scmp.ge.s32.totalorder %s587_s17, 2  ;;  %s321_s24 = scalar_lea.sflag [#allocation4], %s320_s6 }
  0xc0   : > { %p418_p0 = pnand %p771_p12, %p770_p11 }
  0xc2   : > { %p419_p1 = pneg %p418_p0 }
  0xc4   : > { %562 = dma.done.wait (%p419_p1), %s321_s24, 128  }
  0xc5   : > { %564 = vsyncadd (%p419_p1), %s321_s24, 4294967168  ;;  %s19_s17 = sadd.s32 1, %s587_s17   ;;  %s772_s12 = smov %s571_s13 }
  0xc6   : > { %p16_p2 = scmp.ge.s32.totalorder %s19_s17, 4   ;;  %s773_s13 = smov %s575_s14 }
  0xc7   : > { %s774_s14 = smov %s669_s26  ;;  %s775_s15 = smov %s583_s16 }
  0xc8   : > { %s776_s16 = smov %s778_s20  ;;  %18 = sbr.rel (!%p16_p2) target bundleno = 6 (0x6), region = 77 }
  0xcd   :  { %326 = vsyncpa [#allocation3], 1 }
  0xce   :  { %328 = vsyncpa [#allocation3 + $0x1], 1 }
  0xcf   :  { %329 = vsyncpa [#allocation4], 1 }
  0xd0   :  { %331 = vsyncpa [#allocation4 + $0x1], 1 }

</bundles_post_ra>
